<compile_context>
chip_gen: v6e
topology: v6e:2x2x1
jax: 0.10.0
libtpu: 0.0.40
codegen_flags: <defaults>
</compile_context>

<pallas_src>
import math

import jax
import jax.numpy as jnp
from jax.experimental import pallas as pl
from jax.experimental.pallas import tpu as pltpu


# ----------------------------------------------------------------------------
# Pass-through copy kernel (demonstration only; Unsqueeze needs no data path).
# ----------------------------------------------------------------------------
def _copy_kernel(x_ref, o_ref):
    # The Unsqueeze layer does not modify element values.
    o_ref[...] = x_ref[...]


# Lane-dense column candidates (all multiples of 128), widest first: wider
# rows mean fewer, longer contiguous DMA bursts and strictly unmasked vst.
_LANE_CANDIDATES = (32768, 16384, 8192, 4096, 2048, 1024, 512, 256, 128)

# Target ~4 MiB per block.  With double-buffered input + output this is
# ~16 MiB resident — under the explicit 40 MiB scoped-VMEM limit below and
# well under v7x's 64 MiB physical VMEM per TensorCore.
_TARGET_TILE_BYTES = 4 << 20
_VMEM_LIMIT_BYTES = 40 << 20


def _sublane_multiple(dtype) -> int:
    """Native sublane packing multiple: 8 for f32, 16 for bf16, 32 for i8/fp8."""
    itemsize = jnp.dtype(dtype).itemsize
    return max(8, (8 * 4) // max(1, itemsize))


def _choose_2d_view(total: int):
    """Pick a lane-dense (rows, cols) view of the flattened array, preferring
    the widest multiple-of-128 column width that divides `total`.
    Returns None if no such width exists (caller skips the kernel)."""
    for cols in _LANE_CANDIDATES:
        if total % cols == 0:
            return total // cols, cols
    return None


def _choose_tile_rows(rows: int, cols: int, itemsize: int, sub: int) -> int:
    """Fixed row tile: a multiple of `sub` sized near _TARGET_TILE_BYTES.
    The grid uses cdiv, so the last (partial) block is masked by Pallas —
    no divisor-shrinking toward tiny tiles."""
    target = _TARGET_TILE_BYTES // (cols * itemsize)
    target = max(sub, (target // sub) * sub)
    if rows <= target:
        return rows  # single full-extent block along rows
    return target


def _pallas_identity_2d(x2d: jax.Array) -> jax.Array:
    """Identity copy through VMEM with large lane-dense, pipelined blocks."""
    rows, cols = x2d.shape
    itemsize = jnp.dtype(x2d.dtype).itemsize
    sub = _sublane_multiple(x2d.dtype)
    tile_r = _choose_tile_rows(rows, cols, itemsize, sub)
    grid = (pl.cdiv(rows, tile_r),)

    return pl.pallas_call(
        _copy_kernel,
        out_shape=jax.ShapeDtypeStruct((rows, cols), x2d.dtype),
        grid_spec=pltpu.PrefetchScalarGridSpec(
            num_scalar_prefetch=0,
            grid=grid,
            in_specs=[pl.BlockSpec((tile_r, cols), lambda i: (i, 0))],
            out_specs=pl.BlockSpec((tile_r, cols), lambda i: (i, 0)),
        ),
        compiler_params=pltpu.CompilerParams(
            # Row tiles are independent -> shard across v7x's two TCs;
            # harmless on single-TC v5e/v6e.
            dimension_semantics=("parallel",),
            vmem_limit_bytes=_VMEM_LIMIT_BYTES,
        ),
    )(x2d)


class BaseModelPallas:
    """JAX/Pallas equivalent of BaseModel (layers = [Unsqueeze(expected_dim)]).

    The unsqueeze is resolved statically (zero data movement).  By default no
    Pallas kernel is launched for the identity path (per perf review: an
    identity copy through a custom call is pure HBM-traffic overhead that XLA
    cannot elide).  Set use_pallas_copy=True to route the data through the
    optimized pass-through kernel for demonstration.
    """

    def __init__(self, expected_dim: int, use_pallas_copy: bool = False):
        self.expected_dim = expected_dim
        self.use_pallas_copy = use_pallas_copy
        # BaseModel has no learnable parameters.
        # TODO(synk): train_step/train_epoch/train_all/evaluate are host-side
        # training loops (optimizer, data loaders) — out of kernel scope.

    def __call__(self, x: jax.Array) -> jax.Array:
        # Unsqueeze layer: static shape decision, zero data movement.
        if x.ndim == self.expected_dim - 1:
            x = x[None, ...]

        if not self.use_pallas_copy:
            return x  # review #1: elide the identity pallas_call entirely

        shape = x.shape
        total = math.prod(shape) if x.ndim > 0 else 1
        if total == 0:
            return x
        view = _choose_2d_view(total)
        if view is None:
            # Hardened fallback: no lane-dense factorization — skip the kernel
            # instead of risking an oversized full-array VMEM block.
            return x
        rows, cols = view
        y2d = _pallas_identity_2d(x.reshape(rows, cols))
        return y2d.reshape(shape)


if __name__ == "__main__":
    key = jax.random.PRNGKey(0)
    k1, k2 = jax.random.split(key)

    expected_dim = 4  # e.g. a model expecting NCHW batched input

    # Default model: unsqueeze resolved with zero data movement (no kernel).
    model = BaseModelPallas(expected_dim)
    # Demonstration model: routes the data through the tiled Pallas copy.
    model_kernel = BaseModelPallas(expected_dim, use_pallas_copy=True)

    # Case 1: unbatched input (C, H, W) -> gains a leading batch dim.
    x_unbatched = jax.random.normal(k1, (4, 16, 16), dtype=jnp.float32)
    y1 = jax.block_until_ready(model(x_unbatched))
    y1k = jax.block_until_ready(model_kernel(x_unbatched))
    assert y1.shape == (1, 4, 16, 16), y1.shape
    assert y1k.shape == (1, 4, 16, 16), y1k.shape
    assert jnp.array_equal(y1[0], x_unbatched), "value mismatch (elided path)"
    assert jnp.array_equal(y1k[0], x_unbatched), "value mismatch (kernel path)"

    # Case 2: already-batched input (N, C, H, W) -> passes through unchanged.
    x_batched = jax.random.normal(k2, (2, 4, 16, 16), dtype=jnp.float32)
    y2 = jax.block_until_ready(model(x_batched))
    y2k = jax.block_until_ready(model_kernel(x_batched))
    assert y2.shape == (2, 4, 16, 16), y2.shape
    assert y2k.shape == (2, 4, 16, 16), y2k.shape
    assert jnp.array_equal(y2, x_batched), "value mismatch (elided path)"
    assert jnp.array_equal(y2k, x_batched), "value mismatch (kernel path)"

    print("KERNEL_OK")
</pallas_src>

<mosaic_0001>
module attributes {stable_mosaic.version = 11 : i64} {
  func.func @_copy_kernel(%arg0: i32, %arg1: memref<1x1024xf32, #tpu.memory_space<vmem>>, %arg2: memref<1x1024xf32, #tpu.memory_space<vmem>>) attributes {dimension_semantics = [#tpu.dimension_semantics<parallel>], iteration_bounds = array<i64: 1>, scalar_prefetch = 0 : i64, scratch_operands = 0 : i64, tpu.core_type = #tpu.core_type<tc>, window_params = [{transform_indices = @transform_0, window_bounds = array<i64: 1, 1024>}, {transform_indices = @transform_1, window_bounds = array<i64: 1, 1024>}]} {
    %c0 = arith.constant 0 : index
    %c0_0 = arith.constant 0 : index
    %0 = vector.load %arg1[%c0, %c0_0] : memref<1x1024xf32, #tpu.memory_space<vmem>>, vector<1x1024xf32>
    %c0_1 = arith.constant 0 : index
    %c0_2 = arith.constant 0 : index
    %1 = vector.load %arg2[%c0_1, %c0_2] : memref<1x1024xf32, #tpu.memory_space<vmem>>, vector<1x1024xf32>
    tpu.vector_store %arg2[%c0_1, %c0_2], %0 {strides = array<i32>} : memref<1x1024xf32, #tpu.memory_space<vmem>>, vector<1x1024xf32>,
    return
  }
  func.func @transform_0(%arg0: i32) -> (i32, i32) {
    %c0_i32 = arith.constant 0 : i32
    %c0_i32_0 = arith.constant 0 : i32
    return %arg0, %c0_i32 : i32, i32
  }
  func.func @transform_1(%arg0: i32) -> (i32, i32) {
    %c0_i32 = arith.constant 0 : i32
    %c0_i32_0 = arith.constant 0 : i32
    return %arg0, %c0_i32 : i32, i32
  }
}

</mosaic_0001>

<bundles_post_ra>
// kernel: tpu_custom_call.1
= control target key start
LH: loop header
LB: loop body
LE: loop exit
PB: predicated region body
PF: predicated region fallthrough
CT: control target
= control target key end

     0   :  { %6 = vsyncpa [#allocation3], 0  ;;  %s102_s0 = inlined_call_operand.hbm [shape: f32[1,1024], index: 0, kind: input, shape index: {}]   ;;  %s103_s1 = inlined_call_operand.hbm [shape: f32[1,1024], index: 1, kind: output, shape index: {}]  }
   0x1   :  { %7 = vsyncpa [#allocation4], 0  ;;  %s84_s6 = smov [#allocation2]  }
   0x2   :  { %s14_s7 = sshll.u32 %s84_s6, 4  ;;  %s15_s7 = int_to_ptr.vmem [resolvable:$true] %s14_s7 }
   0x3   :  { %s48_s8 = scalar_lea.vmem %s15_s7, 128  ;;  %p53_p1 = scmp.lt.s32.totalorder %s15_s7, %s15_s7 }
   0x4   :  { %p49_p0 = scmp.ne.s32.totalorder %s15_s7, %s48_s8  ;;  %p54_p2 = scmp.lt.s32.totalorder %s48_s8, %s48_s8 }
   0x6   :  { %p55_p3 = por %p54_p2, %p53_p1 }
   0x8   :  { %p56_p4 = pnand %p55_p3, %p49_p0 }
   0xa   :  { %59 = shalt.err (!%p56_p4)
}
   0xb   :  { %17 = dma.hbm_to_vmem [thread:$0]  %s102_s0, 128, %s15_s7, [#allocation3]  }
   0xc   :  { %80 = dma.done.wait [#allocation3], 128  }
   0xd   :  { %81 = vsyncadd [#allocation3], 4294967168  ;;  %s85_s11 = smov [#allocation5]   ;;  %v21_v0 = vld [vmem:[#allocation2] sm:$0xff] }
   0xe   :  { %s29_s12 = sshll.u32 %s85_s11, 4  ;;  %22 = vst [vmem:[#allocation5] sm:$0xff] %v21_v0  ;;  %s30_s12 = int_to_ptr.vmem [resolvable:$true] %s29_s12 }
   0xf   :  { %s60_s13 = scalar_lea.vmem %s30_s12, 128  ;;  %p65_p6 = scmp.lt.s32.totalorder %s30_s12, %s30_s12 }
  0x10   :  { %p61_p5 = scmp.ne.s32.totalorder %s30_s12, %s60_s13  ;;  %p66_p7 = scmp.lt.s32.totalorder %s60_s13, %s60_s13 }
  0x12   :  { %p67_p8 = por %p66_p7, %p65_p6 }
  0x14   :  { %p68_p9 = pnand %p67_p8, %p61_p5 }
  0x16   :  { %71 = shalt.err (!%p68_p9)
}
  0x17   :  { %32 = dma.vmem_to_hbm [thread:$0]  %s30_s12, 128, %s103_s1, [#allocation4]  }
  0x18   :  { %82 = dma.done.wait [#allocation4], 128  }
  0x19   :  { %83 = vsyncadd [#allocation4], 4294967168 }
  0x1a   :  { %36 = vsyncpa [#allocation3], 1 }
  0x1b   :  { %37 = vsyncpa [#allocation4], 1 }

</bundles_post_ra>
